<compile_context>
chip_gen: v7x
topology: tpu7x:2x2x1
jax: 0.10.0
libtpu: 0.0.40
codegen_flags: <defaults>
</compile_context>

<pallas_src>
import functools
import math

import jax
import jax.numpy as jnp
from jax.experimental import pallas as pl
from jax.experimental.pallas import tpu as pltpu

HIDDEN = 128            # config.hidden_size       (lane-dense: multiple of 128)
INTERMEDIATE = 512      # config.intermediate_size (4x hidden, standard BERT ratio)
LN_EPS = 1e-12          # config.layer_norm_eps
USE_BF16_MATMUL = False # flip on for bf16 MXU operands at production shapes
                        # (reference/tolerance here is f32, so default off)


# --------------------------------------------------------------------------- #
# Kernel A: masked weight  Wm = where(scores > logit(t), W, 0)                 #
# --------------------------------------------------------------------------- #
def mask_weight_kernel(w_ref, scores_ref, thr_ref, wm_ref):
    """w_ref/scores_ref: (I, H) VMEM; thr_ref: (1,) SMEM logit threshold."""
    thr_logit = thr_ref[0]
    keep = scores_ref[...] > thr_logit          # == sigmoid(scores) > threshold
    wm_ref[...] = jnp.where(keep, w_ref[...], 0.0).astype(wm_ref.dtype)


# --------------------------------------------------------------------------- #
# Kernel B: fused masked-linear + residual + LayerNorm, tiled over rows       #
# --------------------------------------------------------------------------- #
def bert_output_kernel(x_ref, res_ref, wm_ref, b_ref, gamma_ref, beta_ref,
                       o_ref, *, hidden_size):
    """x_ref: (tm, I); res_ref/o_ref: (tm, H); wm_ref: (I, H) resident;
    b_ref/gamma_ref/beta_ref: (1, H) resident."""
    x = x_ref[...]
    w = wm_ref[...]
    if x.dtype != w.dtype:                       # bf16-operand path
        x = x.astype(w.dtype)

    # MaskedLinear (mask already folded into w); f32 MXU accumulate.
    y = jnp.dot(x, w, preferred_element_type=jnp.float32) + b_ref[...]

    # dropout: identity (eval mode); residual add.
    resid = y + res_ref[...].astype(jnp.float32)                  # (tm, H) f32

    # LayerNorm, single-pass statistics: var = E[x^2] - mean^2.
    inv_h = 1.0 / float(hidden_size)
    s1 = jnp.sum(resid, axis=-1, keepdims=True)
    s2 = jnp.sum(resid * resid, axis=-1, keepdims=True)
    mu = s1 * inv_h
    var = s2 * inv_h - mu * mu
    normed = (resid - mu) * jax.lax.rsqrt(var + LN_EPS)
    o_ref[...] = (normed * gamma_ref[...] + beta_ref[...]).astype(o_ref.dtype)


def _pick_tm(m):
    """Largest row-tile that divides M (MXU-friendly multiples preferred)."""
    for tm in (512, 256, 128, 64, 32, 16, 8):
        if m % tm == 0:
            return tm
    return m


def bert_output(hidden_states, input_tensor, params, threshold):
    """hidden_states: (B,S,I) f32; input_tensor: (B,S,H) f32; threshold: float."""
    B, S, I = hidden_states.shape
    H = input_tensor.shape[-1]
    w, scores, b, gamma, beta = params
    M = B * S
    tm = _pick_tm(M)

    # Fold batch & sequence into rows (free row-major reshape).
    x2d = hidden_states.reshape(M, I)
    res2d = input_tensor.reshape(M, H)

    # sigmoid(s) > t  <=>  s > log(t/(1-t))   (exact for 0 < t < 1).
    # Edge guards: t <= 0 keeps everything, t >= 1 prunes everything.
    t = jnp.float32(threshold)
    thr_logit = jnp.where(
        t <= 0.0, -jnp.inf,
        jnp.where(t >= 1.0, jnp.inf, jnp.log(t) - jnp.log1p(-t)))
    thr_logit = jnp.reshape(thr_logit, (1,))

    vmem = pl.BlockSpec(memory_space=pltpu.MemorySpace.VMEM)
    smem = pl.BlockSpec(memory_space=pltpu.MemorySpace.SMEM)

    wm_dtype = jnp.bfloat16 if USE_BF16_MATMUL else w.dtype

    # ---- Kernel A: materialize the masked weight once per call. ------------
    wm = pl.pallas_call(
        mask_weight_kernel,
        out_shape=jax.ShapeDtypeStruct((I, H), wm_dtype),
        in_specs=[vmem, vmem, smem],
        out_specs=vmem,
    )(w, scores, thr_logit)

    # ---- Kernel B: row-tiled fused matmul + residual + LayerNorm. ----------
    grid = (M // tm,)
    cost = pl.CostEstimate(
        flops=2 * M * I * H,
        transcendentals=0,
        bytes_accessed=4 * (M * I + 2 * M * H) + wm.dtype.itemsize * I * H + 4 * 3 * H,
    )

    out2d = pl.pallas_call(
        functools.partial(bert_output_kernel, hidden_size=H),
        out_shape=jax.ShapeDtypeStruct((M, H), hidden_states.dtype),
        grid=grid,
        in_specs=[
            pl.BlockSpec((tm, I), lambda i: (i, 0)),   # x row tile (streamed)
            pl.BlockSpec((tm, H), lambda i: (i, 0)),   # residual row tile
            pl.BlockSpec((I, H), lambda i: (0, 0)),    # masked weight (resident)
            pl.BlockSpec((1, H), lambda i: (0, 0)),    # bias        (resident)
            pl.BlockSpec((1, H), lambda i: (0, 0)),    # LN gamma    (resident)
            pl.BlockSpec((1, H), lambda i: (0, 0)),    # LN beta     (resident)
        ],
        out_specs=pl.BlockSpec((tm, H), lambda i: (i, 0)),
        compiler_params=pltpu.CompilerParams(
            dimension_semantics=("parallel",)),
        cost_estimate=cost,
    )(x2d, res2d, wm, b, gamma, beta)

    return out2d.reshape(B, S, H)


# --------------------------------------------------------------------------- #
# Pure-JAX reference mirroring the PyTorch forward (eval mode).               #
# --------------------------------------------------------------------------- #
def reference(hidden_states, input_tensor, params, threshold):
    w, scores, b, gamma, beta = params
    sig = 1.0 / (1.0 + jnp.exp(-scores))
    mask = (sig > threshold).astype(w.dtype)
    y = hidden_states @ (w * mask) + b
    resid = y + input_tensor
    mu = resid.mean(-1, keepdims=True)
    var = ((resid - mu) ** 2).mean(-1, keepdims=True)
    return (resid - mu) * jax.lax.rsqrt(var + LN_EPS) * gamma + beta


if __name__ == "__main__":
    B, S = 2, 8
    I, H = INTERMEDIATE, HIDDEN

    key = jax.random.PRNGKey(0)
    k = jax.random.split(key, 7)

    hidden_states = jax.random.normal(k[0], (B, S, I), dtype=jnp.float32)
    input_tensor = jax.random.normal(k[1], (B, S, H), dtype=jnp.float32)

    # Pruning scores; nudge them away from the sigmoid(s)==threshold decision
    # boundary so kernel-vs-XLA ulp differences can never flip a mask bit.
    scores = jax.random.normal(k[3], (I, H), dtype=jnp.float32)
    scores = scores + jnp.where(scores >= 0, 0.05, -0.05)

    params = (
        0.02 * jax.random.normal(k[2], (I, H), dtype=jnp.float32),       # dense weight (in, out)
        scores,                                                          # pruning mask scores
        0.02 * jax.random.normal(k[4], (1, H), dtype=jnp.float32),       # dense bias
        1.0 + 0.1 * jax.random.normal(k[5], (1, H), dtype=jnp.float32),  # LayerNorm weight
        0.02 * jax.random.normal(k[6], (1, H), dtype=jnp.float32),       # LayerNorm bias
    )
    threshold = 0.5

    # TODO(synk): ThresholdBinarizer's "keep at least 0.5% of weights"
    # kth-value fallback is omitted (data-dependent top-k; never triggered here).
    out = bert_output(hidden_states, input_tensor, params, threshold)
    out = jax.block_until_ready(out)

    ref = reference(hidden_states, input_tensor, params, threshold)
    assert out.shape == (B, S, H)
    err = jnp.max(jnp.abs(out - ref))
    assert jnp.allclose(out, ref, atol=1e-4, rtol=1e-4), f"max abs err = {err}"
    print("KERNEL_OK")
</pallas_src>

<mosaic_0001>
module attributes {stable_mosaic.version = 11 : i64} {
  func.func @mask_weight_kernel(%arg0: memref<512x128xf32, #tpu.memory_space<vmem>>, %arg1: memref<512x128xf32, #tpu.memory_space<vmem>>, %arg2: memref<1xf32, #tpu.memory_space<smem>>, %arg3: memref<512x128xf32, #tpu.memory_space<vmem>>) attributes {dimension_semantics = [], scalar_prefetch = 0 : i64, scratch_operands = 0 : i64, tpu.core_type = #tpu.core_type<tc>} {
    %c0 = arith.constant 0 : index
    %0 = memref.load %arg2[%c0] : memref<1xf32, #tpu.memory_space<smem>>
    %c0_0 = arith.constant 0 : index
    %c0_1 = arith.constant 0 : index
    %1 = vector.load %arg1[%c0_0, %c0_1] : memref<512x128xf32, #tpu.memory_space<vmem>>, vector<512x128xf32>
    %2 = vector.broadcast %0 : f32 to vector<512x128xf32>
    %3 = arith.cmpf ogt, %1, %2 : vector<512x128xf32>
    %c0_2 = arith.constant 0 : index
    %c0_3 = arith.constant 0 : index
    %4 = vector.load %arg0[%c0_2, %c0_3] : memref<512x128xf32, #tpu.memory_space<vmem>>, vector<512x128xf32>
    %cst = arith.constant 0.000000e+00 : f32
    %5 = vector.broadcast %cst : f32 to vector<512x128xf32>
    %6 = arith.select %3, %4, %5 : vector<512x128xi1>, vector<512x128xf32>
    %c0_4 = arith.constant 0 : index
    %c0_5 = arith.constant 0 : index
    %7 = vector.load %arg3[%c0_4, %c0_5] : memref<512x128xf32, #tpu.memory_space<vmem>>, vector<512x128xf32>
    tpu.vector_store %arg3[%c0_4, %c0_5], %6 {strides = array<i32>} : memref<512x128xf32, #tpu.memory_space<vmem>>, vector<512x128xf32>,
    return
  }
}

</mosaic_0001>

<bundles_post_ra>
// kernel: tpu_custom_call.1
= control target key start
LH: loop header
LB: loop body
LE: loop exit
PB: predicated region body
PF: predicated region fallthrough
CT: control target
= control target key end

     0   :  { %9 = vsyncpa [#allocation4], 0  ;;  %s600_s0 = inlined_call_operand.hbm [shape: f32[512,128], index: 0, kind: input, shape index: {}]   ;;  %s601_s1 = inlined_call_operand.hbm [shape: f32[512,128], index: 1, kind: input, shape index: {}]   ;;  %s602_s2 = inlined_call_operand.<no memory space> [shape: f32[1], index: 2, kind: input, shape index: {}]   ;;  %s603_s3 = inlined_call_operand.hbm [shape: f32[512,128], index: 3, kind: output, shape index: {}]  }
   0x1   :  { %10 = vsyncpa [#allocation7], 0 }
   0x2   :  { %11 = vsyncpa [#allocation5], 0  ;;  %s461_s12 = smov [#allocation3]   ;;  %s389_s16 = scalar_lea.hbm %s600_s0, 8192 }
   0x3   :  { %s17_s13 = sshll.u32 %s461_s12, 4  ;;  %p390_p0 = scmp.ne.s32.totalorder %s600_s0, %s389_s16  ;;  %s18_s13 = int_to_ptr.vmem [resolvable:$true] %s17_s13 }
   0x4   :  { %p393_p1 = scmp.lt.u32.totalorder %s389_s16, %s600_s0 }
   0x6   :  { %p395_p2 = pnand %p393_p1, %p390_p0 }
   0x8   :  { %398 = shalt.err (!%p395_p2)
}
   0x9   :  { %s399_s21 = scalar_lea.vmem %s18_s13, 8192  ;;  %p404_p4 = scmp.lt.s32.totalorder %s18_s13, %s18_s13 }
   0xa   :  { %p400_p3 = scmp.ne.s32.totalorder %s18_s13, %s399_s21  ;;  %p405_p5 = scmp.lt.s32.totalorder %s399_s21, %s399_s21 }
   0xc   :  { %p406_p6 = por %p405_p5, %p404_p4 }
   0xe   :  { %p407_p7 = pnand %p406_p6, %p400_p3 }
  0x10   :  { %410 = shalt.err (!%p407_p7)
}
  0x11   :  { %s462_s22 = smov 128   ;;  %s463_s23 = smov 8  }
  0x12   :  { %23 = dma.hbm_to_vmem [thread:$0]  %s600_s0, 8192, %s18_s13, [#allocation4], %s462_s22, %s462_s22, %s463_s23  }
  0x13   :  { %s464_s26 = smov [#allocation6]   ;;  %s411_s30 = scalar_lea.hbm %s601_s1, 8192 }
  0x14   :  { %s29_s27 = sshll.u32 %s464_s26, 4  ;;  %p412_p8 = scmp.ne.s32.totalorder %s601_s1, %s411_s30  ;;  %s30_s27 = int_to_ptr.vmem [resolvable:$true] %s29_s27 }
  0x15   :  { %p415_p9 = scmp.lt.u32.totalorder %s411_s30, %s601_s1 }
  0x17   :  { %p417_p10 = pnand %p415_p9, %p412_p8 }
  0x19   :  { %420 = shalt.err (!%p417_p10)
}
  0x1a   :  { %s421_s8 = scalar_lea.vmem %s30_s27, 8192  ;;  %p426_p12 = scmp.lt.s32.totalorder %s30_s27, %s30_s27 }
  0x1b   :  { %p422_p11 = scmp.ne.s32.totalorder %s30_s27, %s421_s8  ;;  %p427_p13 = scmp.lt.s32.totalorder %s421_s8, %s421_s8 }
  0x1d   :  { %p428_p0 = por %p427_p13, %p426_p12 }
  0x1f   :  { %p429_p1 = pnand %p428_p0, %p422_p11 }
  0x21   :  { %432 = shalt.err (!%p429_p1)
}
  0x22   :  { %35 = dma.hbm_to_vmem [thread:$0]  %s601_s1, 8192, %s30_s27, [#allocation7], %s462_s22, %s462_s22, %s463_s23  }
  0x23   :  { %455 = dma.done.wait [#allocation4], 8192  }
  0x24   :  { %456 = vsyncadd [#allocation4], 4294959104 }
  0x25   :  { %457 = dma.done.wait [#allocation7], 8192  }
  0x26   :  { %458 = vsyncadd [#allocation7], 4294959104  ;;  %v519_v0 = vstv %s602_s2  ;;  %v45_v1 = vld [vmem:[#allocation6] sm:$0xff]  ;;  %v46_v3 = vld [vmem:[#allocation6 + $0x8] sm:$0xff]  ;;  %s465_s1 = smov [#allocation8]  }
  0x27   :  { %v174_v2 = vld [vmem:[#allocation3] sm:$0xff]  ;;  %vm110_vm0 = vcmp.gt.f32.partialorder %v45_v1, %v519_v0  ;;  %vm111_vm1 = vcmp.gt.f32.partialorder %v46_v3, %v519_v0  ;;  %v175_v4 = vld [vmem:[#allocation3 + $0x8] sm:$0xff]  ;;  %v47_v5 = vld [vmem:[#allocation6 + $0x10] sm:$0xff]  ;;  %s371_s2 = sshll.u32 %s465_s1, 4  ;;  %s372_s2 = int_to_ptr.vmem [resolvable:$true] %s371_s2 }
  0x28   :  { %v176_v6 = vld [vmem:[#allocation3 + $0x10] sm:$0xff]  ;;  %v238_v7 = vsel %vm110_vm0, %v174_v2, 0.0  ;;  %v239_v8 = vsel %vm111_vm1, %v175_v4, 0.0  ;;  %vm112_vm2 = vcmp.gt.f32.partialorder %v47_v5, %v519_v0  ;;  %v48_v9 = vld [vmem:[#allocation6 + $0x18] sm:$0xff]  ;;  %v49_v11 = vld [vmem:[#allocation6 + $0x20] sm:$0xff]  ;;  %s433_s12 = scalar_lea.vmem %s372_s2, 8192  ;;  %p438_p3 = scmp.lt.s32.totalorder %s372_s2, %s372_s2 }
  0x29   :  { %v177_v10 = vld [vmem:[#allocation3 + $0x18] sm:$0xff]  ;;  %302 = vst [vmem:[#allocation8] sm:$0xff] %v238_v7  ;;  %303 = vst [vmem:[#allocation8 + $0x8] sm:$0xff] %v239_v8  ;;  %v240_v12 = vsel %vm112_vm2, %v176_v6, 0.0  ;;  %vm113_vm3 = vcmp.gt.f32.partialorder %v48_v9, %v519_v0  ;;  %vm114_vm4 = vcmp.gt.f32.partialorder %v49_v11, %v519_v0  ;;  %v178_v13 = vld [vmem:[#allocation3 + $0x20] sm:$0xff]  ;;  %p434_p2 = scmp.ne.s32.totalorder %s372_s2, %s433_s12  ;;  %p439_p4 = scmp.lt.s32.totalorder %s433_s12, %s433_s12 }
  0x2a   :  { %v50_v14 = vld [vmem:[#allocation6 + $0x28] sm:$0xff]  ;;  %304 = vst [vmem:[#allocation8 + $0x10] sm:$0xff] %v240_v12  ;;  %v241_v16 = vsel %vm113_vm3, %v177_v10, 0.0  ;;  %v242_v17 = vsel %vm114_vm4, %v178_v13, 0.0  ;;  %v51_v18 = vld [vmem:[#allocation6 + $0x30] sm:$0xff]  ;;  %v52_v20 = vld [vmem:[#allocation6 + $0x38] sm:$0xff] }
  0x2b   :  { %v179_v15 = vld [vmem:[#allocation3 + $0x28] sm:$0xff]  ;;  %vm115_vm5 = vcmp.gt.f32.partialorder %v50_v14, %v519_v0  ;;  %v180_v19 = vld [vmem:[#allocation3 + $0x30] sm:$0xff]  ;;  %305 = vst [vmem:[#allocation8 + $0x18] sm:$0xff] %v241_v16  ;;  %306 = vst [vmem:[#allocation8 + $0x20] sm:$0xff] %v242_v17  ;;  %vm116_vm6 = vcmp.gt.f32.partialorder %v51_v18, %v519_v0  ;;  %vm117_vm7 = vcmp.gt.f32.partialorder %v52_v20, %v519_v0  ;;  %p440_p5 = por %p439_p4, %p438_p3 }
  0x2c   :  { %v243_v21 = vsel %vm115_vm5, %v179_v15, 0.0  ;;  %v181_v22 = vld [vmem:[#allocation3 + $0x38] sm:$0xff]  ;;  %v53_v23 = vld [vmem:[#allocation6 + $0x40] sm:$0xff]  ;;  %v244_v25 = vsel %vm116_vm6, %v180_v19, 0.0  ;;  %v54_v27 = vld [vmem:[#allocation6 + $0x48] sm:$0xff] }
  0x2d   :  { %v182_v24 = vld [vmem:[#allocation3 + $0x40] sm:$0xff]  ;;  %307 = vst [vmem:[#allocation8 + $0x28] sm:$0xff] %v243_v21  ;;  %v245_v26 = vsel %vm117_vm7, %v181_v22, 0.0  ;;  %vm118_vm8 = vcmp.gt.f32.partialorder %v53_v23, %v519_v0  ;;  %v183_v28 = vld [vmem:[#allocation3 + $0x48] sm:$0xff]  ;;  %v55_v29 = vld [vmem:[#allocation6 + $0x50] sm:$0xff]  ;;  %vm119_vm9 = vcmp.gt.f32.partialorder %v54_v27, %v519_v0  ;;  %p441_p6 = pnand %p440_p5, %p434_p2 }
  0x2e   :  { %308 = vst [vmem:[#allocation8 + $0x30] sm:$0xff] %v244_v25  ;;  %309 = vst [vmem:[#allocation8 + $0x38] sm:$0xff] %v245_v26  ;;  %v246_v30 = vsel %vm118_vm8, %v182_v24, 0.0  ;;  %vm120_vm10 = vcmp.gt.f32.partialorder %v55_v29, %v519_v0  ;;  %v184_v31 = vld [vmem:[#allocation3 + $0x50] sm:$0xff]  ;;  %v56_v32 = vld [vmem:[#allocation6 + $0x58] sm:$0xff]  ;;  %v247_v34 = vsel %vm119_vm9, %v183_v28, 0.0 }
  0x2f   :  { %v185_v33 = vld [vmem:[#allocation3 + $0x58] sm:$0xff]  ;;  %310 = vst [vmem:[#allocation8 + $0x40] sm:$0xff] %v246_v30  ;;  %v248_v35 = vsel %vm120_vm10, %v184_v31, 0.0  ;;  %vm121_vm11 = vcmp.gt.f32.partialorder %v56_v32, %v519_v0  ;;  %v57_v36 = vld [vmem:[#allocation6 + $0x60] sm:$0xff]  ;;  %v58_v38 = vld [vmem:[#allocation6 + $0x68] sm:$0xff] }
  0x30   :  { %v186_v37 = vld [vmem:[#allocation3 + $0x60] sm:$0xff]  ;;  %311 = vst [vmem:[#allocation8 + $0x48] sm:$0xff] %v247_v34  ;;  %312 = vst [vmem:[#allocation8 + $0x50] sm:$0xff] %v248_v35  ;;  %v249_v39 = vsel %vm121_vm11, %v185_v33, 0.0  ;;  %vm122_vm12 = vcmp.gt.f32.partialorder %v57_v36, %v519_v0  ;;  %vm123_vm13 = vcmp.gt.f32.partialorder %v58_v38, %v519_v0  ;;  %v187_v40 = vld [vmem:[#allocation3 + $0x68] sm:$0xff] }
  0x31   :  { %v59_v41 = vld [vmem:[#allocation6 + $0x70] sm:$0xff]  ;;  %313 = vst [vmem:[#allocation8 + $0x58] sm:$0xff] %v249_v39  ;;  %v250_v43 = vsel %vm122_vm12, %v186_v37, 0.0  ;;  %v251_v44 = vsel %vm123_vm13, %v187_v40, 0.0  ;;  %v60_v45 = vld [vmem:[#allocation6 + $0x78] sm:$0xff]  ;;  %v61_v47 = vld [vmem:[#allocation6 + $0x80] sm:$0xff] }
  0x32   :  { %v188_v42 = vld [vmem:[#allocation3 + $0x70] sm:$0xff]  ;;  %vm124_vm14 = vcmp.gt.f32.partialorder %v59_v41, %v519_v0  ;;  %v189_v46 = vld [vmem:[#allocation3 + $0x78] sm:$0xff]  ;;  %314 = vst [vmem:[#allocation8 + $0x60] sm:$0xff] %v250_v43  ;;  %315 = vst [vmem:[#allocation8 + $0x68] sm:$0xff] %v251_v44  ;;  %vm125_vm15 = vcmp.gt.f32.partialorder %v60_v45, %v519_v0  ;;  %vm126_vm0 = vcmp.gt.f32.partialorder %v61_v47, %v519_v0 }
  0x33   :  { %v252_v48 = vsel %vm124_vm14, %v188_v42, 0.0  ;;  %v190_v49 = vld [vmem:[#allocation3 + $0x80] sm:$0xff]  ;;  %v62_v50 = vld [vmem:[#allocation6 + $0x88] sm:$0xff]  ;;  %v253_v52 = vsel %vm125_vm15, %v189_v46, 0.0  ;;  %v63_v54 = vld [vmem:[#allocation6 + $0x90] sm:$0xff] }
  0x34   :  { %v191_v51 = vld [vmem:[#allocation3 + $0x88] sm:$0xff]  ;;  %316 = vst [vmem:[#allocation8 + $0x70] sm:$0xff] %v252_v48  ;;  %v254_v53 = vsel %vm126_vm0, %v190_v49, 0.0  ;;  %vm127_vm1 = vcmp.gt.f32.partialorder %v62_v50, %v519_v0  ;;  %v192_v55 = vld [vmem:[#allocation3 + $0x90] sm:$0xff]  ;;  %v64_v56 = vld [vmem:[#allocation6 + $0x98] sm:$0xff]  ;;  %vm128_vm2 = vcmp.gt.f32.partialorder %v63_v54, %v519_v0 }
  0x35   :  { %317 = vst [vmem:[#allocation8 + $0x78] sm:$0xff] %v253_v52  ;;  %318 = vst [vmem:[#allocation8 + $0x80] sm:$0xff] %v254_v53  ;;  %v255_v57 = vsel %vm127_vm1, %v191_v51, 0.0  ;;  %vm129_vm3 = vcmp.gt.f32.partialorder %v64_v56, %v519_v0  ;;  %v193_v58 = vld [vmem:[#allocation3 + $0x98] sm:$0xff]  ;;  %v65_v59 = vld [vmem:[#allocation6 + $0xa0] sm:$0xff]  ;;  %v256_v61 = vsel %vm128_vm2, %v192_v55, 0.0 }
  0x36   :  { %v194_v60 = vld [vmem:[#allocation3 + $0xa0] sm:$0xff]  ;;  %319 = vst [vmem:[#allocation8 + $0x88] sm:$0xff] %v255_v57  ;;  %v257_v62 = vsel %vm129_vm3, %v193_v58, 0.0  ;;  %vm130_vm4 = vcmp.gt.f32.partialorder %v65_v59, %v519_v0  ;;  %v66_v63 = vld [vmem:[#allocation6 + $0xa8] sm:$0xff]  ;;  %v67_v2 = vld [vmem:[#allocation6 + $0xb0] sm:$0xff] }
  0x37   :  { %v195_v1 = vld [vmem:[#allocation3 + $0xa8] sm:$0xff]  ;;  %320 = vst [vmem:[#allocation8 + $0x90] sm:$0xff] %v256_v61  ;;  %321 = vst [vmem:[#allocation8 + $0x98] sm:$0xff] %v257_v62  ;;  %v258_v3 = vsel %vm130_vm4, %v194_v60, 0.0  ;;  %vm131_vm5 = vcmp.gt.f32.partialorder %v66_v63, %v519_v0  ;;  %vm132_vm6 = vcmp.gt.f32.partialorder %v67_v2, %v519_v0  ;;  %v196_v4 = vld [vmem:[#allocation3 + $0xb0] sm:$0xff] }
  0x38   :  { %v68_v5 = vld [vmem:[#allocation6 + $0xb8] sm:$0xff]  ;;  %322 = vst [vmem:[#allocation8 + $0xa0] sm:$0xff] %v258_v3  ;;  %v259_v7 = vsel %vm131_vm5, %v195_v1, 0.0  ;;  %v260_v8 = vsel %vm132_vm6, %v196_v4, 0.0  ;;  %v69_v9 = vld [vmem:[#allocation6 + $0xc0] sm:$0xff]  ;;  %v70_v11 = vld [vmem:[#allocation6 + $0xc8] sm:$0xff] }
  0x39   :  { %v197_v6 = vld [vmem:[#allocation3 + $0xb8] sm:$0xff]  ;;  %vm133_vm7 = vcmp.gt.f32.partialorder %v68_v5, %v519_v0  ;;  %v198_v10 = vld [vmem:[#allocation3 + $0xc0] sm:$0xff]  ;;  %323 = vst [vmem:[#allocation8 + $0xa8] sm:$0xff] %v259_v7  ;;  %324 = vst [vmem:[#allocation8 + $0xb0] sm:$0xff] %v260_v8  ;;  %vm134_vm8 = vcmp.gt.f32.partialorder %v69_v9, %v519_v0  ;;  %vm135_vm9 = vcmp.gt.f32.partialorder %v70_v11, %v519_v0 }
  0x3a   :  { %v261_v12 = vsel %vm133_vm7, %v197_v6, 0.0  ;;  %v199_v13 = vld [vmem:[#allocation3 + $0xc8] sm:$0xff]  ;;  %v71_v14 = vld [vmem:[#allocation6 + $0xd0] sm:$0xff]  ;;  %v262_v16 = vsel %vm134_vm8, %v198_v10, 0.0  ;;  %v72_v18 = vld [vmem:[#allocation6 + $0xd8] sm:$0xff] }
  0x3b   :  { %v200_v15 = vld [vmem:[#allocation3 + $0xd0] sm:$0xff]  ;;  %325 = vst [vmem:[#allocation8 + $0xb8] sm:$0xff] %v261_v12  ;;  %v263_v17 = vsel %vm135_vm9, %v199_v13, 0.0  ;;  %vm136_vm10 = vcmp.gt.f32.partialorder %v71_v14, %v519_v0  ;;  %v201_v19 = vld [vmem:[#allocation3 + $0xd8] sm:$0xff]  ;;  %v73_v20 = vld [vmem:[#allocation6 + $0xe0] sm:$0xff]  ;;  %vm137_vm11 = vcmp.gt.f32.partialorder %v72_v18, %v519_v0 }
  0x3c   :  { %326 = vst [vmem:[#allocation8 + $0xc0] sm:$0xff] %v262_v16  ;;  %327 = vst [vmem:[#allocation8 + $0xc8] sm:$0xff] %v263_v17  ;;  %v264_v21 = vsel %vm136_vm10, %v200_v15, 0.0  ;;  %vm138_vm12 = vcmp.gt.f32.partialorder %v73_v20, %v519_v0  ;;  %v202_v22 = vld [vmem:[#allocation3 + $0xe0] sm:$0xff]  ;;  %v74_v23 = vld [vmem:[#allocation6 + $0xe8] sm:$0xff]  ;;  %v265_v25 = vsel %vm137_vm11, %v201_v19, 0.0 }
  0x3d   :  { %v203_v24 = vld [vmem:[#allocation3 + $0xe8] sm:$0xff]  ;;  %328 = vst [vmem:[#allocation8 + $0xd0] sm:$0xff] %v264_v21  ;;  %v266_v26 = vsel %vm138_vm12, %v202_v22, 0.0  ;;  %vm139_vm13 = vcmp.gt.f32.partialorder %v74_v23, %v519_v0  ;;  %v75_v27 = vld [vmem:[#allocation6 + $0xf0] sm:$0xff]  ;;  %v76_v29 = vld [vmem:[#allocation6 + $0xf8] sm:$0xff] }
  0x3e   :  { %v204_v28 = vld [vmem:[#allocation3 + $0xf0] sm:$0xff]  ;;  %329 = vst [vmem:[#allocation8 + $0xd8] sm:$0xff] %v265_v25  ;;  %330 = vst [vmem:[#allocation8 + $0xe0] sm:$0xff] %v266_v26  ;;  %v267_v30 = vsel %vm139_vm13, %v203_v24, 0.0  ;;  %vm140_vm14 = vcmp.gt.f32.partialorder %v75_v27, %v519_v0  ;;  %vm141_vm15 = vcmp.gt.f32.partialorder %v76_v29, %v519_v0  ;;  %v205_v31 = vld [vmem:[#allocation3 + $0xf8] sm:$0xff] }
  0x3f   :  { %v77_v32 = vld [vmem:[#allocation6 + $0x100] sm:$0xff]  ;;  %331 = vst [vmem:[#allocation8 + $0xe8] sm:$0xff] %v267_v30  ;;  %v268_v34 = vsel %vm140_vm14, %v204_v28, 0.0  ;;  %v269_v35 = vsel %vm141_vm15, %v205_v31, 0.0  ;;  %v78_v36 = vld [vmem:[#allocation6 + $0x108] sm:$0xff]  ;;  %v79_v38 = vld [vmem:[#allocation6 + $0x110] sm:$0xff] }
  0x40   :  { %v206_v33 = vld [vmem:[#allocation3 + $0x100] sm:$0xff]  ;;  %vm142_vm0 = vcmp.gt.f32.partialorder %v77_v32, %v519_v0  ;;  %v207_v37 = vld [vmem:[#allocation3 + $0x108] sm:$0xff]  ;;  %332 = vst [vmem:[#allocation8 + $0xf0] sm:$0xff] %v268_v34  ;;  %333 = vst [vmem:[#allocation8 + $0xf8] sm:$0xff] %v269_v35  ;;  %vm143_vm1 = vcmp.gt.f32.partialorder %v78_v36, %v519_v0  ;;  %vm144_vm2 = vcmp.gt.f32.partialorder %v79_v38, %v519_v0 }
  0x41   :  { %v270_v39 = vsel %vm142_vm0, %v206_v33, 0.0  ;;  %v208_v40 = vld [vmem:[#allocation3 + $0x110] sm:$0xff]  ;;  %v80_v41 = vld [vmem:[#allocation6 + $0x118] sm:$0xff]  ;;  %v271_v43 = vsel %vm143_vm1, %v207_v37, 0.0  ;;  %v81_v45 = vld [vmem:[#allocation6 + $0x120] sm:$0xff] }
  0x42   :  { %v209_v42 = vld [vmem:[#allocation3 + $0x118] sm:$0xff]  ;;  %334 = vst [vmem:[#allocation8 + $0x100] sm:$0xff] %v270_v39  ;;  %v272_v44 = vsel %vm144_vm2, %v208_v40, 0.0  ;;  %vm145_vm3 = vcmp.gt.f32.partialorder %v80_v41, %v519_v0  ;;  %v210_v46 = vld [vmem:[#allocation3 + $0x120] sm:$0xff]  ;;  %v82_v47 = vld [vmem:[#allocation6 + $0x128] sm:$0xff]  ;;  %vm146_vm4 = vcmp.gt.f32.partialorder %v81_v45, %v519_v0 }
  0x43   :  { %335 = vst [vmem:[#allocation8 + $0x108] sm:$0xff] %v271_v43  ;;  %336 = vst [vmem:[#allocation8 + $0x110] sm:$0xff] %v272_v44  ;;  %v273_v48 = vsel %vm145_vm3, %v209_v42, 0.0  ;;  %vm147_vm5 = vcmp.gt.f32.partialorder %v82_v47, %v519_v0  ;;  %v211_v49 = vld [vmem:[#allocation3 + $0x128] sm:$0xff]  ;;  %v83_v50 = vld [vmem:[#allocation6 + $0x130] sm:$0xff]  ;;  %v274_v52 = vsel %vm146_vm4, %v210_v46, 0.0 }
  0x44   :  { %v212_v51 = vld [vmem:[#allocation3 + $0x130] sm:$0xff]  ;;  %337 = vst [vmem:[#allocation8 + $0x118] sm:$0xff] %v273_v48  ;;  %v275_v53 = vsel %vm147_vm5, %v211_v49, 0.0  ;;  %vm148_vm6 = vcmp.gt.f32.partialorder %v83_v50, %v519_v0  ;;  %v84_v54 = vld [vmem:[#allocation6 + $0x138] sm:$0xff]  ;;  %v85_v56 = vld [vmem:[#allocation6 + $0x140] sm:$0xff] }
  0x45   :  { %v213_v55 = vld [vmem:[#allocation3 + $0x138] sm:$0xff]  ;;  %338 = vst [vmem:[#allocation8 + $0x120] sm:$0xff] %v274_v52  ;;  %339 = vst [vmem:[#allocation8 + $0x128] sm:$0xff] %v275_v53  ;;  %v276_v57 = vsel %vm148_vm6, %v212_v51, 0.0  ;;  %vm149_vm7 = vcmp.gt.f32.partialorder %v84_v54, %v519_v0  ;;  %vm150_vm8 = vcmp.gt.f32.partialorder %v85_v56, %v519_v0  ;;  %v214_v58 = vld [vmem:[#allocation3 + $0x140] sm:$0xff] }
  0x46   :  { %v86_v59 = vld [vmem:[#allocation6 + $0x148] sm:$0xff]  ;;  %340 = vst [vmem:[#allocation8 + $0x130] sm:$0xff] %v276_v57  ;;  %v277_v61 = vsel %vm149_vm7, %v213_v55, 0.0  ;;  %v278_v62 = vsel %vm150_vm8, %v214_v58, 0.0  ;;  %v87_v63 = vld [vmem:[#allocation6 + $0x150] sm:$0xff]  ;;  %v88_v2 = vld [vmem:[#allocation6 + $0x158] sm:$0xff] }
  0x47   :  { %v215_v60 = vld [vmem:[#allocation3 + $0x148] sm:$0xff]  ;;  %vm151_vm9 = vcmp.gt.f32.partialorder %v86_v59, %v519_v0  ;;  %v216_v1 = vld [vmem:[#allocation3 + $0x150] sm:$0xff]  ;;  %341 = vst [vmem:[#allocation8 + $0x138] sm:$0xff] %v277_v61  ;;  %342 = vst [vmem:[#allocation8 + $0x140] sm:$0xff] %v278_v62  ;;  %vm152_vm10 = vcmp.gt.f32.partialorder %v87_v63, %v519_v0  ;;  %vm153_vm11 = vcmp.gt.f32.partialorder %v88_v2, %v519_v0 }
  0x48   :  { %v279_v3 = vsel %vm151_vm9, %v215_v60, 0.0  ;;  %v217_v4 = vld [vmem:[#allocation3 + $0x158] sm:$0xff]  ;;  %v89_v5 = vld [vmem:[#allocation6 + $0x160] sm:$0xff]  ;;  %v280_v7 = vsel %vm152_vm10, %v216_v1, 0.0  ;;  %v90_v9 = vld [vmem:[#allocation6 + $0x168] sm:$0xff] }
  0x49   :  { %v218_v6 = vld [vmem:[#allocation3 + $0x160] sm:$0xff]  ;;  %343 = vst [vmem:[#allocation8 + $0x148] sm:$0xff] %v279_v3  ;;  %v281_v8 = vsel %vm153_vm11, %v217_v4, 0.0  ;;  %vm154_vm12 = vcmp.gt.f32.partialorder %v89_v5, %v519_v0  ;;  %v219_v10 = vld [vmem:[#allocation3 + $0x168] sm:$0xff]  ;;  %v91_v11 = vld [vmem:[#allocation6 + $0x170] sm:$0xff]  ;;  %vm155_vm13 = vcmp.gt.f32.partialorder %v90_v9, %v519_v0 }
  0x4a   :  { %344 = vst [vmem:[#allocation8 + $0x150] sm:$0xff] %v280_v7  ;;  %345 = vst [vmem:[#allocation8 + $0x158] sm:$0xff] %v281_v8  ;;  %v282_v12 = vsel %vm154_vm12, %v218_v6, 0.0  ;;  %vm156_vm14 = vcmp.gt.f32.partialorder %v91_v11, %v519_v0  ;;  %v220_v13 = vld [vmem:[#allocation3 + $0x170] sm:$0xff]  ;;  %v92_v14 = vld [vmem:[#allocation6 + $0x178] sm:$0xff]  ;;  %v283_v16 = vsel %vm155_vm13, %v219_v10, 0.0 }
  0x4b   :  { %v221_v15 = vld [vmem:[#allocation3 + $0x178] sm:$0xff]  ;;  %346 = vst [vmem:[#allocation8 + $0x160] sm:$0xff] %v282_v12  ;;  %v284_v17 = vsel %vm156_vm14, %v220_v13, 0.0  ;;  %vm157_vm15 = vcmp.gt.f32.partialorder %v92_v14, %v519_v0  ;;  %v93_v18 = vld [vmem:[#allocation6 + $0x180] sm:$0xff]  ;;  %v94_v20 = vld [vmem:[#allocation6 + $0x188] sm:$0xff] }
  0x4c   :  { %v222_v19 = vld [vmem:[#allocation3 + $0x180] sm:$0xff]  ;;  %347 = vst [vmem:[#allocation8 + $0x168] sm:$0xff] %v283_v16  ;;  %348 = vst [vmem:[#allocation8 + $0x170] sm:$0xff] %v284_v17  ;;  %v285_v21 = vsel %vm157_vm15, %v221_v15, 0.0  ;;  %vm158_vm0 = vcmp.gt.f32.partialorder %v93_v18, %v519_v0  ;;  %vm159_vm1 = vcmp.gt.f32.partialorder %v94_v20, %v519_v0  ;;  %v223_v22 = vld [vmem:[#allocation3 + $0x188] sm:$0xff] }
  0x4d   :  { %v95_v23 = vld [vmem:[#allocation6 + $0x190] sm:$0xff]  ;;  %349 = vst [vmem:[#allocation8 + $0x178] sm:$0xff] %v285_v21  ;;  %v286_v25 = vsel %vm158_vm0, %v222_v19, 0.0  ;;  %v287_v26 = vsel %vm159_vm1, %v223_v22, 0.0  ;;  %v96_v27 = vld [vmem:[#allocation6 + $0x198] sm:$0xff]  ;;  %v97_v29 = vld [vmem:[#allocation6 + $0x1a0] sm:$0xff] }
  0x4e   :  { %v224_v24 = vld [vmem:[#allocation3 + $0x190] sm:$0xff]  ;;  %vm160_vm2 = vcmp.gt.f32.partialorder %v95_v23, %v519_v0  ;;  %v225_v28 = vld [vmem:[#allocation3 + $0x198] sm:$0xff]  ;;  %350 = vst [vmem:[#allocation8 + $0x180] sm:$0xff] %v286_v25  ;;  %351 = vst [vmem:[#allocation8 + $0x188] sm:$0xff] %v287_v26  ;;  %vm161_vm3 = vcmp.gt.f32.partialorder %v96_v27, %v519_v0  ;;  %vm162_vm4 = vcmp.gt.f32.partialorder %v97_v29, %v519_v0 }
  0x4f   :  { %v288_v30 = vsel %vm160_vm2, %v224_v24, 0.0  ;;  %v226_v31 = vld [vmem:[#allocation3 + $0x1a0] sm:$0xff]  ;;  %v98_v32 = vld [vmem:[#allocation6 + $0x1a8] sm:$0xff]  ;;  %v289_v34 = vsel %vm161_vm3, %v225_v28, 0.0  ;;  %v99_v36 = vld [vmem:[#allocation6 + $0x1b0] sm:$0xff] }
  0x50   :  { %v227_v33 = vld [vmem:[#allocation3 + $0x1a8] sm:$0xff]  ;;  %352 = vst [vmem:[#allocation8 + $0x190] sm:$0xff] %v288_v30  ;;  %v290_v35 = vsel %vm162_vm4, %v226_v31, 0.0  ;;  %vm163_vm5 = vcmp.gt.f32.partialorder %v98_v32, %v519_v0  ;;  %v228_v37 = vld [vmem:[#allocation3 + $0x1b0] sm:$0xff]  ;;  %v100_v38 = vld [vmem:[#allocation6 + $0x1b8] sm:$0xff]  ;;  %vm164_vm6 = vcmp.gt.f32.partialorder %v99_v36, %v519_v0 }
  0x51   :  { %353 = vst [vmem:[#allocation8 + $0x198] sm:$0xff] %v289_v34  ;;  %354 = vst [vmem:[#allocation8 + $0x1a0] sm:$0xff] %v290_v35  ;;  %v291_v39 = vsel %vm163_vm5, %v227_v33, 0.0  ;;  %vm165_vm7 = vcmp.gt.f32.partialorder %v100_v38, %v519_v0  ;;  %v229_v40 = vld [vmem:[#allocation3 + $0x1b8] sm:$0xff]  ;;  %v101_v41 = vld [vmem:[#allocation6 + $0x1c0] sm:$0xff]  ;;  %v292_v43 = vsel %vm164_vm6, %v228_v37, 0.0 }
  0x52   :  { %v230_v42 = vld [vmem:[#allocation3 + $0x1c0] sm:$0xff]  ;;  %355 = vst [vmem:[#allocation8 + $0x1a8] sm:$0xff] %v291_v39  ;;  %v293_v44 = vsel %vm165_vm7, %v229_v40, 0.0  ;;  %vm166_vm8 = vcmp.gt.f32.partialorder %v101_v41, %v519_v0  ;;  %v102_v45 = vld [vmem:[#allocation6 + $0x1c8] sm:$0xff]  ;;  %v103_v47 = vld [vmem:[#allocation6 + $0x1d0] sm:$0xff] }
  0x53   :  { %v231_v46 = vld [vmem:[#allocation3 + $0x1c8] sm:$0xff]  ;;  %356 = vst [vmem:[#allocation8 + $0x1b0] sm:$0xff] %v292_v43  ;;  %357 = vst [vmem:[#allocation8 + $0x1b8] sm:$0xff] %v293_v44  ;;  %v294_v48 = vsel %vm166_vm8, %v230_v42, 0.0  ;;  %vm167_vm9 = vcmp.gt.f32.partialorder %v102_v45, %v519_v0  ;;  %vm168_vm10 = vcmp.gt.f32.partialorder %v103_v47, %v519_v0  ;;  %v232_v49 = vld [vmem:[#allocation3 + $0x1d0] sm:$0xff] }
  0x54   :  { %v104_v50 = vld [vmem:[#allocation6 + $0x1d8] sm:$0xff]  ;;  %358 = vst [vmem:[#allocation8 + $0x1c0] sm:$0xff] %v294_v48  ;;  %v295_v52 = vsel %vm167_vm9, %v231_v46, 0.0  ;;  %v296_v53 = vsel %vm168_vm10, %v232_v49, 0.0  ;;  %v105_v54 = vld [vmem:[#allocation6 + $0x1e0] sm:$0xff]  ;;  %v106_v56 = vld [vmem:[#allocation6 + $0x1e8] sm:$0xff] }
  0x55   :  { %v233_v51 = vld [vmem:[#allocation3 + $0x1d8] sm:$0xff]  ;;  %vm169_vm11 = vcmp.gt.f32.partialorder %v104_v50, %v519_v0  ;;  %v234_v55 = vld [vmem:[#allocation3 + $0x1e0] sm:$0xff]  ;;  %359 = vst [vmem:[#allocation8 + $0x1c8] sm:$0xff] %v295_v52  ;;  %360 = vst [vmem:[#allocation8 + $0x1d0] sm:$0xff] %v296_v53  ;;  %vm170_vm12 = vcmp.gt.f32.partialorder %v105_v54, %v519_v0  ;;  %vm171_vm13 = vcmp.gt.f32.partialorder %v106_v56, %v519_v0 }
  0x56   :  { %v297_v57 = vsel %vm169_vm11, %v233_v51, 0.0  ;;  %v235_v58 = vld [vmem:[#allocation3 + $0x1e8] sm:$0xff]  ;;  %v107_v59 = vld [vmem:[#allocation6 + $0x1f0] sm:$0xff]  ;;  %v298_v61 = vsel %vm170_vm12, %v234_v55, 0.0  ;;  %v108_v63 = vld [vmem:[#allocation6 + $0x1f8] sm:$0xff] }
  0x57   :  { %v236_v60 = vld [vmem:[#allocation3 + $0x1f0] sm:$0xff]  ;;  %361 = vst [vmem:[#allocation8 + $0x1d8] sm:$0xff] %v297_v57  ;;  %v299_v62 = vsel %vm171_vm13, %v235_v58, 0.0  ;;  %vm172_vm14 = vcmp.gt.f32.partialorder %v107_v59, %v519_v0  ;;  %v237_v1 = vld [vmem:[#allocation3 + $0x1f8] sm:$0xff]  ;;  %362 = vst [vmem:[#allocation8 + $0x1e0] sm:$0xff] %v298_v61  ;;  %vm173_vm15 = vcmp.gt.f32.partialorder %v108_v63, %v519_v0 }
  0x58   :  { %363 = vst [vmem:[#allocation8 + $0x1e8] sm:$0xff] %v299_v62  ;;  %v300_v2 = vsel %vm172_vm14, %v236_v60, 0.0  ;;  %v301_v3 = vsel %vm173_vm15, %v237_v1, 0.0 }
  0x59   :  { %364 = vst [vmem:[#allocation8 + $0x1f0] sm:$0xff] %v300_v2  ;;  %365 = vst [vmem:[#allocation8 + $0x1f8] sm:$0xff] %v301_v3 }
  0x5a   :  { %444 = shalt.err (!%p441_p6)
}
  0x5b   :  { %s445_s15 = scalar_lea.hbm %s603_s3, 8192 }
  0x5c   :  { %p446_p7 = scmp.ne.s32.totalorder %s603_s3, %s445_s15  ;;  %p449_p8 = scmp.lt.u32.totalorder %s445_s15, %s603_s3 }
  0x5e   :  { %p451_p9 = pnand %p449_p8, %p446_p7 }
  0x60   :  { %454 = shalt.err (!%p451_p9)
}
  0x61   :  { %377 = dma.vmem_to_hbm [thread:$0]  %s372_s2, 8192, %s603_s3, [#allocation5], %s462_s22, %s462_s22, %s463_s23  }
  0x62   :  { %459 = dma.done.wait [#allocation5], 8192  }
  0x63   :  { %460 = vsyncadd [#allocation5], 4294959104 }
  0x64   :  { %381 = vsyncpa [#allocation4], 1 }
  0x65   :  { %382 = vsyncpa [#allocation7], 1 }
  0x66   :  { %383 = vsyncpa [#allocation5], 1 }

</bundles_post_ra>
